<compile_context>
chip_gen: v6e
topology: v6e:2x2x1
jax: 0.10.0
libtpu: 0.0.40
codegen_flags: <defaults>
</compile_context>

<pallas_src>
import functools
import math

import jax
import jax.numpy as jnp
from jax.experimental import pallas as pl
from jax.experimental.pallas import tpu as pltpu


OUT_WIDTH = 128  # lane-dense packed output slab width (probs | logits | conf | ent | pad)


def _round_up(x, m):
    return ((x + m - 1) // m) * m


# --------------------------------------------------------------------------- #
# Kernel
# --------------------------------------------------------------------------- #
def _router_kernel(x_ref, w1_ref, b1_ref, w2_ref, b2_ref, wh_ref, bh_ref,
                   temp_ref, out_ref, *, num_tasks):
    T = num_tasks

    # ---- Hidden MLP (dropout is identity at inference) -----------------------
    # bf16 MXU operands, f32 accumulate; bias add / ReLU in f32 on the VPU.
    # Hidden dims are zero-padded to multiples of 128 lanes (pads stay exactly
    # zero through bias-add/ReLU, so results are unchanged).
    h = jnp.dot(x_ref[...], w1_ref[...],
                preferred_element_type=jnp.float32) + b1_ref[...]
    h = jnp.maximum(h, 0.0)
    h = jnp.dot(h.astype(jnp.bfloat16), w2_ref[...],
                preferred_element_type=jnp.float32) + b2_ref[...]
    h = jnp.maximum(h, 0.0)

    # ---- Fused, lane-padded head: one matmul for logits (x2) + confidence ----
    # cols [0:T)   -> routing logits (softmaxed below)
    # cols [T:2T)  -> routing logits (raw copy, passed through)
    # col  2T      -> confidence logit
    head = jnp.dot(h.astype(jnp.bfloat16), wh_ref[...],
                   preferred_element_type=jnp.float32) + bh_ref[...]

    rows, width = head.shape
    col = jax.lax.broadcasted_iota(jnp.int32, (rows, width), 1)
    softmax_cols = col < T

    # Temperature-scaled softmax over the first T columns only.
    inv_temp = 1.0 / jnp.maximum(temp_ref[0], jnp.float32(0.1))   # SMEM scalar
    scaled = head * inv_temp
    masked = jnp.where(softmax_cols, scaled, -jnp.inf)
    m = jnp.max(masked, axis=-1, keepdims=True)
    e = jnp.exp(masked - m)                      # exactly 0 outside softmax cols
    sum_e = jnp.sum(e, axis=-1, keepdims=True)
    inv_sum = pl.reciprocal(sum_e, approx=True)  # EUP slot, ~free
    probs = e * inv_sum                          # zero outside softmax cols

    # Entropy from the softmax intermediates:
    #   -sum p log p = log(sum_e) - sum p * (scaled - m)
    # (e == 0 and (scaled - m) finite outside the softmax cols, so no masking).
    ent = jnp.log(sum_e) - inv_sum * jnp.sum(e * (scaled - m),
                                             axis=-1, keepdims=True)

    conf = jax.nn.sigmoid(head)                  # only col 2T is meaningful

    # Additive packing: probs | raw logits | confidence | entropy | zero pad.
    logit_cols = jnp.logical_and(col >= T, col < 2 * T)
    packed = (probs
              + jnp.where(logit_cols, head, 0.0)
              + jnp.where(col == 2 * T, conf, 0.0)
              + jnp.where(col == 2 * T + 1, ent, 0.0))
    out_ref[...] = packed.astype(out_ref.dtype)


# --------------------------------------------------------------------------- #
# Parameter preparation (done ONCE, not per forward call)
# --------------------------------------------------------------------------- #
def prepare_router_params(params):
    """Pack + pad + cast raw f32 params into kernel-ready form (hoisted).

    - hidden dims h1/h2 are zero-padded up to multiples of 128 lanes,
    - routing head + confidence head are fused into one [h2p, 128] matrix,
    - matmul weights are cast to bf16, biases stay f32.
    """
    input_size, h1 = params["w1"].shape
    h2 = params["w2"].shape[1]
    T = params["wo"].shape[1]
    assert 2 * T + 2 <= OUT_WIDTH, "num_tasks too large for packed slab"

    h1p = _round_up(h1, 128)
    h2p = _round_up(h2, 128)

    w1 = jnp.zeros((input_size, h1p), jnp.float32).at[:, :h1].set(params["w1"])
    b1 = jnp.zeros((1, h1p), jnp.float32).at[:, :h1].set(params["b1"])
    w2 = jnp.zeros((h1p, h2p), jnp.float32).at[:h1, :h2].set(params["w2"])
    b2 = jnp.zeros((1, h2p), jnp.float32).at[:, :h2].set(params["b2"])

    wh = jnp.zeros((h2p, OUT_WIDTH), jnp.float32)
    wh = wh.at[:h2, 0:T].set(params["wo"])
    wh = wh.at[:h2, T:2 * T].set(params["wo"])
    wh = wh.at[:h2, 2 * T:2 * T + 1].set(params["wc"])
    bh = jnp.zeros((1, OUT_WIDTH), jnp.float32)
    bh = bh.at[:, 0:T].set(params["bo"])
    bh = bh.at[:, T:2 * T].set(params["bo"])
    bh = bh.at[:, 2 * T:2 * T + 1].set(params["bc"])

    return {
        "w1": w1.astype(jnp.bfloat16), "b1": b1,
        "w2": w2.astype(jnp.bfloat16), "b2": b2,
        "wh": wh.astype(jnp.bfloat16), "bh": bh,
        "num_tasks": T, "input_size": input_size,
    }


# --------------------------------------------------------------------------- #
# Tiling / VMEM heuristics
# --------------------------------------------------------------------------- #
def _pick_tile(batch, input_size, *, target_tile_bytes=4 << 20, max_tile_rows=4096):
    # Per-row HBM traffic: bf16 x read + bf16 packed-slab writeback.
    bytes_per_row = 2 * input_size + 2 * OUT_WIDTH
    tb_bw = _round_up(
        max(256, min(max_tile_rows, target_tile_bytes // bytes_per_row)), 16)
    # Keep >=2 grid steps when the batch allows it (v7x has 2 TensorCores that
    # share the "parallel" batch axis); min bf16 tile is 16 rows.
    tb_split = _round_up(pl.cdiv(_round_up(max(batch, 1), 16), 2), 16)
    return max(16, min(tb_bw, tb_split))


def _vmem_limit_bytes(tb, input_size, h1p, h2p):
    bf16, f32, dbl = 2, 4, 2
    tiles = tb * (input_size + OUT_WIDTH) * bf16 * dbl            # x / out (double-buffered)
    weights = (input_size * h1p + h1p * h2p + h2p * OUT_WIDTH) * bf16 * dbl
    biases = (h1p + h2p + OUT_WIDTH) * f32 * dbl
    acts = tb * (h1p + h2p + 8 * OUT_WIDTH) * f32                 # f32 intermediates
    est = int((tiles + weights + biases + acts) * 1.5)
    return int(min(max(est, 32 << 20), 64 << 20))                 # stay <= v7x physical


# --------------------------------------------------------------------------- #
# Forward wrapper
# --------------------------------------------------------------------------- #
def dynamic_router_forward(x, prepared, temperature):
    """Fused router forward (eval mode).

    Args:
      x: [batch, input_size] float32 embeddings.
      prepared: output of prepare_router_params (packed/padded/bf16 weights).
      temperature: scalar float32.

    Returns:
      dict with routing_probs [B, T], routing_logits [B, T],
      confidence [B, 1], entropy [B]  (all bf16 — see notes on precision).
    """
    batch, input_size = x.shape
    assert input_size == prepared["input_size"]
    T = prepared["num_tasks"]
    h1p = prepared["w1"].shape[1]
    h2p = prepared["w2"].shape[1]

    tb = _pick_tile(batch, input_size)
    b_pad = _round_up(batch, tb)
    if b_pad != batch:
        x = jnp.pad(x, ((0, b_pad - batch), (0, 0)))
    x_bf16 = x.astype(jnp.bfloat16)

    temp = jnp.asarray(temperature, jnp.float32).reshape((1,))

    resident = lambda i: (0, 0)
    kernel = functools.partial(_router_kernel, num_tasks=T)

    packed = pl.pallas_call(
        kernel,
        out_shape=jax.ShapeDtypeStruct((b_pad, OUT_WIDTH), jnp.bfloat16),
        grid=(b_pad // tb,),
        in_specs=[
            pl.BlockSpec((tb, input_size), lambda i: (i, 0)),   # x tile
            pl.BlockSpec((input_size, h1p), resident),          # w1 (VMEM-resident)
            pl.BlockSpec((1, h1p), resident),                   # b1
            pl.BlockSpec((h1p, h2p), resident),                 # w2
            pl.BlockSpec((1, h2p), resident),                   # b2
            pl.BlockSpec((h2p, OUT_WIDTH), resident),           # fused head weight
            pl.BlockSpec((1, OUT_WIDTH), resident),             # fused head bias
            pl.BlockSpec(memory_space=pltpu.MemorySpace.SMEM),  # temperature scalar
        ],
        out_specs=pl.BlockSpec((tb, OUT_WIDTH), lambda i: (i, 0)),
        compiler_params=pltpu.CompilerParams(
            dimension_semantics=("parallel",),
            vmem_limit_bytes=_vmem_limit_bytes(tb, input_size, h1p, h2p)),
    )(x_bf16, prepared["w1"], prepared["b1"], prepared["w2"], prepared["b2"],
      prepared["wh"], prepared["bh"], temp)

    return {
        "routing_probs": packed[:batch, 0:T],
        "routing_logits": packed[:batch, T:2 * T],
        "confidence": packed[:batch, 2 * T:2 * T + 1],
        "entropy": packed[:batch, 2 * T + 1],
    }


# --------------------------------------------------------------------------- #
# Init + reference
# --------------------------------------------------------------------------- #
def init_router_params(key, input_size, hidden_sizes, num_tasks):
    """Deterministic init mirroring DynamicRouter.reset_parameters.

    Hidden layers: kaiming_uniform_(a=sqrt(5)) -> U(-1/sqrt(fan_in), 1/sqrt(fan_in)),
    zero bias. Output / confidence heads: normal(std=0.02), zero bias.
    Weights are stored transposed as [in, out], f32.
    """
    h1, h2 = hidden_sizes
    k1, k2, k3, k4 = jax.random.split(key, 4)

    def kaiming_uniform_t(k, fan_in, fan_out):
        bound = 1.0 / math.sqrt(fan_in)
        w = jax.random.uniform(k, (fan_out, fan_in), jnp.float32, -bound, bound)
        return w.T

    return {
        "w1": kaiming_uniform_t(k1, input_size, h1),
        "b1": jnp.zeros((1, h1), jnp.float32),
        "w2": kaiming_uniform_t(k2, h1, h2),
        "b2": jnp.zeros((1, h2), jnp.float32),
        "wo": (0.02 * jax.random.normal(k3, (num_tasks, h2), jnp.float32)).T,
        "bo": jnp.zeros((1, num_tasks), jnp.float32),
        "wc": (0.02 * jax.random.normal(k4, (1, h2), jnp.float32)).T,
        "bc": jnp.zeros((1, 1), jnp.float32),
    }


def _reference_forward(x, params, temperature):
    """Plain-JAX reference (bf16 MXU operands, f32 accumulate, f32 epilogue)."""
    xb = x.astype(jnp.bfloat16)
    w1 = params["w1"].astype(jnp.bfloat16)
    w2 = params["w2"].astype(jnp.bfloat16)
    wo = params["wo"].astype(jnp.bfloat16)
    wc = params["wc"].astype(jnp.bfloat16)
    h = jnp.maximum(jnp.dot(xb, w1, preferred_element_type=jnp.float32)
                    + params["b1"], 0.0)
    h = jnp.maximum(jnp.dot(h.astype(jnp.bfloat16), w2,
                            preferred_element_type=jnp.float32)
                    + params["b2"], 0.0)
    hb = h.astype(jnp.bfloat16)
    logits = jnp.dot(hb, wo, preferred_element_type=jnp.float32) + params["bo"]
    scaled = logits / jnp.maximum(jnp.float32(temperature), 0.1)
    probs = jax.nn.softmax(scaled, axis=-1)
    conf = jax.nn.sigmoid(jnp.dot(hb, wc, preferred_element_type=jnp.float32)
                          + params["bc"])
    ent = -jnp.sum(probs * jnp.log(probs + 1e-8), axis=-1)
    return probs, logits, conf, ent


if __name__ == "__main__":
    # Small shapes consistent with the module's MLP structure.
    batch = 8
    input_size = 128
    hidden_sizes = [64, 32]
    num_tasks = 5
    temperature = 1.0

    key = jax.random.PRNGKey(0)
    k_param, k_x = jax.random.split(key)
    raw_params = init_router_params(k_param, input_size, hidden_sizes, num_tasks)
    params = prepare_router_params(raw_params)   # one-time packing / bf16 / padding
    x = jax.random.normal(k_x, (batch, input_size), jnp.float32)

    out = dynamic_router_forward(x, params, temperature)
    jax.block_until_ready(out)

    # Correctness check against a plain-JAX reference (bf16 matmuls, approx
    # reciprocal, bf16 output slab, and the eps-free entropy formulation
    # introduce small numeric drift).
    ref_probs, ref_logits, ref_conf, ref_ent = _reference_forward(
        x, raw_params, jnp.float32(temperature))
    assert jnp.allclose(out["routing_probs"].astype(jnp.float32),
                        ref_probs, atol=2e-2, rtol=2e-2)
    assert jnp.allclose(out["routing_logits"].astype(jnp.float32),
                        ref_logits, atol=2e-2, rtol=2e-2)
    assert jnp.allclose(out["confidence"].astype(jnp.float32),
                        ref_conf, atol=2e-2, rtol=2e-2)
    assert jnp.allclose(out["entropy"].astype(jnp.float32),
                        ref_ent, atol=2e-2, rtol=2e-2)

    print("KERNEL_OK")
</pallas_src>

<mosaic_0001>
module attributes {stable_mosaic.version = 11 : i64} {
  func.func @_router_kernel(%arg0: i32, %arg1: memref<16x128xbf16, #tpu.memory_space<vmem>>, %arg2: memref<128x128xbf16, #tpu.memory_space<vmem>>, %arg3: memref<1x128xf32, #tpu.memory_space<vmem>>, %arg4: memref<128x128xbf16, #tpu.memory_space<vmem>>, %arg5: memref<1x128xf32, #tpu.memory_space<vmem>>, %arg6: memref<128x128xbf16, #tpu.memory_space<vmem>>, %arg7: memref<1x128xf32, #tpu.memory_space<vmem>>, %arg8: memref<1xf32, #tpu.memory_space<smem>>, %arg9: memref<16x128xbf16, #tpu.memory_space<vmem>>) attributes {dimension_semantics = [#tpu.dimension_semantics<parallel>], iteration_bounds = array<i64: 1>, scalar_prefetch = 0 : i64, scratch_operands = 0 : i64, tpu.core_type = #tpu.core_type<tc>, window_params = [{transform_indices = @transform_0, window_bounds = array<i64: 16, 128>}, {pipeline_mode = #tpu.pipeline_mode<synchronous>, transform_indices = @transform_1, window_bounds = array<i64: 128, 128>}, {pipeline_mode = #tpu.pipeline_mode<synchronous>, transform_indices = @transform_2, window_bounds = array<i64: 1, 128>}, {pipeline_mode = #tpu.pipeline_mode<synchronous>, transform_indices = @transform_3, window_bounds = array<i64: 128, 128>}, {pipeline_mode = #tpu.pipeline_mode<synchronous>, transform_indices = @transform_4, window_bounds = array<i64: 1, 128>}, {pipeline_mode = #tpu.pipeline_mode<synchronous>, transform_indices = @transform_5, window_bounds = array<i64: 128, 128>}, {pipeline_mode = #tpu.pipeline_mode<synchronous>, transform_indices = @transform_6, window_bounds = array<i64: 1, 128>}, {transform_indices = @transform_7, window_bounds = array<i64: 1>}, {transform_indices = @transform_8, window_bounds = array<i64: 16, 128>}]} {
    %c0 = arith.constant 0 : index
    %c0_0 = arith.constant 0 : index
    %0 = vector.load %arg1[%c0, %c0_0] : memref<16x128xbf16, #tpu.memory_space<vmem>>, vector<16x128xbf16>
    %c0_1 = arith.constant 0 : index
    %c0_2 = arith.constant 0 : index
    %1 = vector.load %arg2[%c0_1, %c0_2] : memref<128x128xbf16, #tpu.memory_space<vmem>>, vector<128x128xbf16>
    %cst = arith.constant dense<0.000000e+00> : vector<16x128xf32>
    %2 = tpu.matmul %0, %1, %cst {dimension_numbers = #tpu.dot_dimension_numbers<[1], [0], [0], [1], [0, 0, 1, 1], [], []>} : vector<16x128xbf16>, vector<128x128xbf16>, vector<16x128xf32> -> vector<16x128xf32>
    %c0_3 = arith.constant 0 : index
    %c0_4 = arith.constant 0 : index
    %3 = vector.load %arg3[%c0_3, %c0_4] : memref<1x128xf32, #tpu.memory_space<vmem>>, vector<1x128xf32>
    %4 = vector.broadcast %3 : vector<1x128xf32> to vector<16x128xf32>
    %5 = arith.addf %2, %4 : vector<16x128xf32>
    %cst_5 = arith.constant 0.000000e+00 : f32
    %6 = vector.broadcast %cst_5 : f32 to vector<16x128xf32>
    %7 = arith.maximumf %5, %6 : vector<16x128xf32>
    %8 = arith.truncf %7 : vector<16x128xf32> to vector<16x128xbf16>
    %c0_6 = arith.constant 0 : index
    %c0_7 = arith.constant 0 : index
    %9 = vector.load %arg4[%c0_6, %c0_7] : memref<128x128xbf16, #tpu.memory_space<vmem>>, vector<128x128xbf16>
    %cst_8 = arith.constant dense<0.000000e+00> : vector<16x128xf32>
    %10 = tpu.matmul %8, %9, %cst_8 {dimension_numbers = #tpu.dot_dimension_numbers<[1], [0], [0], [1], [0, 0, 1, 1], [], []>} : vector<16x128xbf16>, vector<128x128xbf16>, vector<16x128xf32> -> vector<16x128xf32>
    %c0_9 = arith.constant 0 : index
    %c0_10 = arith.constant 0 : index
    %11 = vector.load %arg5[%c0_9, %c0_10] : memref<1x128xf32, #tpu.memory_space<vmem>>, vector<1x128xf32>
    %12 = vector.broadcast %11 : vector<1x128xf32> to vector<16x128xf32>
    %13 = arith.addf %10, %12 : vector<16x128xf32>
    %cst_11 = arith.constant 0.000000e+00 : f32
    %14 = vector.broadcast %cst_11 : f32 to vector<16x128xf32>
    %15 = arith.maximumf %13, %14 : vector<16x128xf32>
    %16 = arith.truncf %15 : vector<16x128xf32> to vector<16x128xbf16>
    %c0_12 = arith.constant 0 : index
    %c0_13 = arith.constant 0 : index
    %17 = vector.load %arg6[%c0_12, %c0_13] : memref<128x128xbf16, #tpu.memory_space<vmem>>, vector<128x128xbf16>
    %cst_14 = arith.constant dense<0.000000e+00> : vector<16x128xf32>
    %18 = tpu.matmul %16, %17, %cst_14 {dimension_numbers = #tpu.dot_dimension_numbers<[1], [0], [0], [1], [0, 0, 1, 1], [], []>} : vector<16x128xbf16>, vector<128x128xbf16>, vector<16x128xf32> -> vector<16x128xf32>
    %c0_15 = arith.constant 0 : index
    %c0_16 = arith.constant 0 : index
    %19 = vector.load %arg7[%c0_15, %c0_16] : memref<1x128xf32, #tpu.memory_space<vmem>>, vector<1x128xf32>
    %20 = vector.broadcast %19 : vector<1x128xf32> to vector<16x128xf32>
    %21 = arith.addf %18, %20 : vector<16x128xf32>
    %22 = tpu.iota {dimensions = array<i32: 1>} : vector<16x128xi32>
    %c5_i32 = arith.constant 5 : i32
    %23 = vector.broadcast %c5_i32 : i32 to vector<16x128xi32>
    %24 = arith.cmpi slt, %22, %23 : vector<16x128xi32>
    %c0_17 = arith.constant 0 : index
    %25 = memref.load %arg8[%c0_17] : memref<1xf32, #tpu.memory_space<smem>>
    %cst_18 = arith.constant 1.000000e-01 : f32
    %26 = arith.maximumf %25, %cst_18 : f32
    %cst_19 = arith.constant 1.000000e+00 : f32
    %27 = arith.divf %cst_19, %26 : f32
    %28 = vector.broadcast %27 : f32 to vector<16x128xf32>
    %29 = arith.mulf %21, %28 : vector<16x128xf32>
    %cst_20 = arith.constant 0xFF800000 : f32
    %30 = vector.broadcast %cst_20 : f32 to vector<16x128xf32>
    %31 = arith.select %24, %29, %30 : vector<16x128xi1>, vector<16x128xf32>
    %cst_21 = arith.constant dense<0xFF800000> : vector<16xf32>
    %32 = vector.multi_reduction <maximumf>, %31, %cst_21 [1] : vector<16x128xf32> to vector<16xf32>
    %33 = vector.shape_cast %32 : vector<16xf32> to vector<16x1xf32>
    %34 = vector.broadcast %33 : vector<16x1xf32> to vector<16x128xf32>
    %35 = arith.subf %31, %34 : vector<16x128xf32>
    %36 = math.exp %35 : vector<16x128xf32>
    %cst_22 = arith.constant dense<0.000000e+00> : vector<16xf32>
    %37 = vector.multi_reduction <add>, %36, %cst_22 [1] : vector<16x128xf32> to vector<16xf32>
    %38 = vector.shape_cast %37 : vector<16xf32> to vector<16x1xf32>
    %39 = tpu.reciprocal %38 {approx = true} : vector<16x1xf32> -> vector<16x1xf32>
    %40 = vector.broadcast %39 : vector<16x1xf32> to vector<16x128xf32>
    %41 = arith.mulf %36, %40 : vector<16x128xf32>
    %42 = math.log %38 : vector<16x1xf32>
    %43 = vector.broadcast %33 : vector<16x1xf32> to vector<16x128xf32>
    %44 = arith.subf %29, %43 : vector<16x128xf32>
    %45 = arith.mulf %36, %44 : vector<16x128xf32>
    %cst_23 = arith.constant dense<0.000000e+00> : vector<16xf32>
    %46 = vector.multi_reduction <add>, %45, %cst_23 [1] : vector<16x128xf32> to vector<16xf32>
    %47 = vector.shape_cast %46 : vector<16xf32> to vector<16x1xf32>
    %48 = arith.mulf %39, %47 : vector<16x1xf32>
    %49 = arith.subf %42, %48 : vector<16x1xf32>
    %50 = arith.negf %21 : vector<16x128xf32>
    %51 = math.exp %50 : vector<16x128xf32>
    %cst_24 = arith.constant 1.000000e+00 : f32
    %52 = vector.broadcast %cst_24 : f32 to vector<16x128xf32>
    %53 = arith.addf %52, %51 : vector<16x128xf32>
    %54 = arith.divf %52, %53 : vector<16x128xf32>
    %c5_i32_25 = arith.constant 5 : i32
    %55 = vector.broadcast %c5_i32_25 : i32 to vector<16x128xi32>
    %56 = arith.cmpi sge, %22, %55 : vector<16x128xi32>
    %c10_i32 = arith.constant 10 : i32
    %57 = vector.broadcast %c10_i32 : i32 to vector<16x128xi32>
    %58 = arith.cmpi slt, %22, %57 : vector<16x128xi32>
    %59 = arith.andi %56, %58 : vector<16x128xi1>
    %cst_26 = arith.constant 0.000000e+00 : f32
    %60 = vector.broadcast %cst_26 : f32 to vector<16x128xf32>
    %61 = arith.select %59, %21, %60 : vector<16x128xi1>, vector<16x128xf32>
    %62 = arith.addf %41, %61 : vector<16x128xf32>
    %c10_i32_27 = arith.constant 10 : i32
    %63 = vector.broadcast %c10_i32_27 : i32 to vector<16x128xi32>
    %64 = arith.cmpi eq, %22, %63 : vector<16x128xi32>
    %cst_28 = arith.constant 0.000000e+00 : f32
    %65 = vector.broadcast %cst_28 : f32 to vector<16x128xf32>
    %66 = arith.select %64, %54, %65 : vector<16x128xi1>, vector<16x128xf32>
    %67 = arith.addf %62, %66 : vector<16x128xf32>
    %c11_i32 = arith.constant 11 : i32
    %68 = vector.broadcast %c11_i32 : i32 to vector<16x128xi32>
    %69 = arith.cmpi eq, %22, %68 : vector<16x128xi32>
    %cst_29 = arith.constant 0.000000e+00 : f32
    %70 = vector.shape_cast %49 : vector<16x1xf32> to vector<16x1xf32>
    %71 = vector.broadcast %70 : vector<16x1xf32> to vector<16x128xf32>
    %72 = vector.broadcast %cst_29 : f32 to vector<16x128xf32>
    %73 = arith.select %69, %71, %72 : vector<16x128xi1>, vector<16x128xf32>
    %74 = arith.addf %67, %73 : vector<16x128xf32>
    %75 = arith.truncf %74 : vector<16x128xf32> to vector<16x128xbf16>
    %c0_30 = arith.constant 0 : index
    %c0_31 = arith.constant 0 : index
    %76 = vector.load %arg9[%c0_30, %c0_31] : memref<16x128xbf16, #tpu.memory_space<vmem>>, vector<16x128xbf16>
    tpu.vector_store %arg9[%c0_30, %c0_31], %75 {strides = array<i32>} : memref<16x128xbf16, #tpu.memory_space<vmem>>, vector<16x128xbf16>,
    return
  }
  func.func @transform_0(%arg0: i32) -> (i32, i32) {
    %c0_i32 = arith.constant 0 : i32
    %c0_i32_0 = arith.constant 0 : i32
    return %arg0, %c0_i32 : i32, i32
  }
  func.func @transform_1(%arg0: i32) -> (i32, i32) {
    %c0_i32 = arith.constant 0 : i32
    %c0_i32_0 = arith.constant 0 : i32
    %c0_i32_1 = arith.constant 0 : i32
    return %c0_i32, %c0_i32_0 : i32, i32
  }
  func.func @transform_2(%arg0: i32) -> (i32, i32) {
    %c0_i32 = arith.constant 0 : i32
    %c0_i32_0 = arith.constant 0 : i32
    %c0_i32_1 = arith.constant 0 : i32
    return %c0_i32, %c0_i32_0 : i32, i32
  }
  func.func @transform_3(%arg0: i32) -> (i32, i32) {
    %c0_i32 = arith.constant 0 : i32
    %c0_i32_0 = arith.constant 0 : i32
    %c0_i32_1 = arith.constant 0 : i32
    return %c0_i32, %c0_i32_0 : i32, i32
  }
  func.func @transform_4(%arg0: i32) -> (i32, i32) {
    %c0_i32 = arith.constant 0 : i32
    %c0_i32_0 = arith.constant 0 : i32
    %c0_i32_1 = arith.constant 0 : i32
    return %c0_i32, %c0_i32_0 : i32, i32
  }
  func.func @transform_5(%arg0: i32) -> (i32, i32) {
    %c0_i32 = arith.constant 0 : i32
    %c0_i32_0 = arith.constant 0 : i32
    %c0_i32_1 = arith.constant 0 : i32
    return %c0_i32, %c0_i32_0 : i32, i32
  }
  func.func @transform_6(%arg0: i32) -> (i32, i32) {
    %c0_i32 = arith.constant 0 : i32
    %c0_i32_0 = arith.constant 0 : i32
    %c0_i32_1 = arith.constant 0 : i32
    return %c0_i32, %c0_i32_0 : i32, i32
  }
  func.func @transform_7(%arg0: i32) -> i32 {
    %c0_i32 = arith.constant 0 : i32
    %c0_i32_0 = arith.constant 0 : i32
    return %c0_i32 : i32
  }
  func.func @transform_8(%arg0: i32) -> (i32, i32) {
    %c0_i32 = arith.constant 0 : i32
    %c0_i32_0 = arith.constant 0 : i32
    return %arg0, %c0_i32 : i32, i32
  }
}

</mosaic_0001>

<bundles_post_ra>
// kernel: tpu_custom_call.1
= control target key start
LH: loop header
LB: loop body
LE: loop exit
PB: predicated region body
PF: predicated region fallthrough
CT: control target
= control target key end

     0   :  { %14 = vsyncpa [#allocation4], 0  ;;  %s982_s0 = inlined_call_operand.hbm [shape: bf16[16,128], index: 0, kind: input, shape index: {}]   ;;  %s983_s1 = inlined_call_operand.hbm [shape: bf16[128,128], index: 1, kind: input, shape index: {}]   ;;  %s984_s2 = inlined_call_operand.vmem [shape: f32[1,128], index: 2, kind: input, shape index: {}]   ;;  %s985_s3 = inlined_call_operand.hbm [shape: bf16[128,128], index: 3, kind: input, shape index: {}]   ;;  %s986_s4 = inlined_call_operand.vmem [shape: f32[1,128], index: 4, kind: input, shape index: {}]   ;;  %s987_s5 = inlined_call_operand.hbm [shape: bf16[128,128], index: 5, kind: input, shape index: {}]   ;;  %s988_s6 = inlined_call_operand.vmem [shape: f32[1,128], index: 6, kind: input, shape index: {}]   ;;  %s989_s7 = inlined_call_operand.<no memory space> [shape: f32[1], index: 7, kind: input, shape index: {}]   ;;  %s990_s8 = inlined_call_operand.hbm [shape: bf16[16,128], index: 8, kind: output, shape index: {}]  }
   0x1   :  { %15 = vsyncpa [#allocation7], 0 }
   0x2   :  { %16 = vsyncpa [#allocation10], 0 }
   0x3   :  { %17 = vsyncpa [#allocation5], 0  ;;  %s835_s27 = smov [#allocation6]   ;;  %s836_s29 = smov [#allocation3]  }
   0x4   :  { %s35_s28 = sshll.u32 %s835_s27, 4  ;;  %s23_s30 = sshll.u32 %s836_s29, 4  ;;  %s36_s28 = int_to_ptr.vmem [resolvable:$true] %s35_s28  ;;  %s24_s30 = int_to_ptr.vmem [resolvable:$true] %s23_s30 }
   0x5   :  { %s735_s9 = scalar_lea.vmem %s36_s28, 1024  ;;  %p740_p1 = scmp.lt.s32.totalorder %s36_s28, %s36_s28 }
   0x6   :  { %p736_p0 = scmp.ne.s32.totalorder %s36_s28, %s735_s9  ;;  %p741_p2 = scmp.lt.s32.totalorder %s735_s9, %s735_s9 }
   0x8   :  { %p742_p3 = por %p741_p2, %p740_p1 }
   0xa   :  { %p743_p4 = pnand %p742_p3, %p736_p0 }
   0xc   :  { %746 = shalt.err (!%p743_p4)
}
   0xd   :  { %s837_s10 = smov 64   ;;  %s838_s11 = smov 4  }
   0xe   :  { %41 = dma.hbm_to_vmem [thread:$0]  %s983_s1, 1024, %s36_s28, [#allocation7], %s837_s10, %s837_s10, %s838_s11  }
   0xf   :  { %s755_s14 = scalar_lea.vmem %s24_s30, 128  ;;  %p760_p6 = scmp.lt.s32.totalorder %s24_s30, %s24_s30 }
  0x10   :  { %p756_p5 = scmp.ne.s32.totalorder %s24_s30, %s755_s14  ;;  %p761_p7 = scmp.lt.s32.totalorder %s755_s14, %s755_s14 }
  0x12   :  { %p762_p8 = por %p761_p7, %p760_p6 }
  0x14   :  { %p763_p9 = pnand %p762_p8, %p756_p5 }
  0x16   :  { %766 = shalt.err (!%p763_p9)
}
  0x17   :  { %29 = dma.hbm_to_vmem [thread:$0]  %s982_s0, 128, %s24_s30, [#allocation4], %s837_s10, %s837_s10, %s838_s11  }
  0x18   :  { %s839_s17 = smov [#allocation8]   ;;  %s840_s19 = smov [#allocation9]  }
  0x19   :  { %s49_s18 = sshll.u32 %s839_s17, 4  ;;  %s63_s20 = sshll.u32 %s840_s19, 4  ;;  %s50_s18 = int_to_ptr.vmem [resolvable:$true] %s49_s18  ;;  %s64_s20 = int_to_ptr.vmem [resolvable:$true] %s63_s20 }
  0x1a   :  { %s775_s1 = scalar_lea.vmem %s50_s18, 1024  ;;  %p780_p11 = scmp.lt.s32.totalorder %s50_s18, %s50_s18 }
  0x1b   :  { %p776_p10 = scmp.ne.s32.totalorder %s50_s18, %s775_s1  ;;  %p781_p12 = scmp.lt.s32.totalorder %s775_s1, %s775_s1 }
  0x1d   :  { %p782_p13 = por %p781_p12, %p780_p11 }
  0x1f   :  { %p783_p0 = pnand %p782_p13, %p776_p10 }
  0x21   :  { %786 = shalt.err (!%p783_p0)
}
  0x22   :  { %55 = dma.hbm_to_vmem [thread:$0]  %s985_s3, 1024, %s50_s18, [#allocation7], %s837_s10, %s837_s10, %s838_s11  }
  0x23   :  { %s795_s0 = scalar_lea.vmem %s64_s20, 1024  ;;  %p800_p2 = scmp.lt.s32.totalorder %s64_s20, %s64_s20 }
  0x24   :  { %p796_p1 = scmp.ne.s32.totalorder %s64_s20, %s795_s0  ;;  %p801_p3 = scmp.lt.s32.totalorder %s795_s0, %s795_s0 }
  0x26   :  { %p802_p4 = por %p801_p3, %p800_p2 }
  0x28   :  { %p803_p5 = pnand %p802_p4, %p796_p1 }
  0x2a   :  { %806 = shalt.err (!%p803_p5)
}
  0x2b   :  { %69 = dma.hbm_to_vmem [thread:$0]  %s987_s5, 1024, %s64_s20, [#allocation10], %s837_s10, %s837_s10, %s838_s11  }
  0x2c   :  { %827 = dma.done.wait [#allocation4], 128  }
  0x2d   :  { %828 = vsyncadd [#allocation4], 4294967168 }
  0x2e   :  { %829 = dma.done.wait [#allocation7], 2048  }
  0x2f   :  { %830 = vsyncadd [#allocation7], 4294965248 }
  0x30   :  { %831 = dma.done.wait [#allocation10], 1024  }
  0x31   :  { %832 = vsyncadd [#allocation10], 4294966272  ;;  %v841_v0 = vmov 0.0   ;;  %vm842_vm0 = vmmov 0   ;;  %v680_v1 = vld [vmem:[#allocation6 + $0x38] sm:$0xff]   ;;  %v681_v2 = vld [vmem:[#allocation6 + $0x30] sm:$0xff]   ;;  %v437_v48 = vlaneseq }
  0x32   :  { %608 = vmatprep.subr.bf16.mxu0 %v841_v0  ;;  %624 = vmatprep.mubr.msk.bf16.mxu0 %vm842_vm0, %v841_v0  ;;  %v682_v3 = vld [vmem:[#allocation6 + $0x28] sm:$0xff]   ;;  %v689_v4 = vld [vmem:[#allocation8 + $0x38] sm:$0xff]   ;;  %v683_v5 = vld [vmem:[#allocation6 + $0x20] sm:$0xff]  }
  0x33   :  { %628 = vmatprep.subr.bf16.mxu1 %v841_v0  ;;  %644 = vmatprep.mubr.msk.bf16.mxu1 %vm842_vm0, %v841_v0  ;;  %v690_v6 = vld [vmem:[#allocation8 + $0x30] sm:$0xff]   ;;  %v684_v7 = vld [vmem:[#allocation6 + $0x18] sm:$0xff]   ;;  %v691_v8 = vld [vmem:[#allocation8 + $0x28] sm:$0xff]   ;;  %v956_v51 = vand.u32 127, %v437_v48 }
  0x34   :  { %609 = vmatpush3.bf16.msra.mxu0 %v680_v1  ;;  %629 = vmatpush3.bf16.msra.mxu1 %v689_v4  ;;  %v685_v9 = vld [vmem:[#allocation6 + $0x10] sm:$0xff]   ;;  %v692_v10 = vld [vmem:[#allocation8 + $0x20] sm:$0xff]   ;;  %v686_v11 = vld [vmem:[#allocation6 + $0x8] sm:$0xff]  }
  0x35   :  { %610 = vmatprep.subr.bf16.mxu0 %v841_v0  ;;  %630 = vmatprep.subr.bf16.mxu1 %v841_v0  ;;  %v693_v12 = vld [vmem:[#allocation8 + $0x18] sm:$0xff]   ;;  %v687_v13 = vld [vmem:[#allocation6] sm:$0xff]   ;;  %v694_v15 = vld [vmem:[#allocation8 + $0x10] sm:$0xff]   ;;  %vm439_vm1 = vcmp.lt.s32.totalorder %v956_v51, 5  ;;  %vm496_vm2 = vcmp.ge.s32.totalorder %v956_v51, 5  ;;  %vm497_vm3 = vcmp.lt.s32.totalorder %v956_v51, 10 }
  0x36   :  { %v688_v14 = vld [vmem:[#allocation3] sm:$0xff]   ;;  %v695_v16 = vld [vmem:[#allocation8 + $0x8] sm:$0xff]   ;;  %v696_v17 = vld [vmem:[#allocation8] sm:$0xff]   ;;  %vm503_vm5 = vcmp.eq.s32.totalorder %v956_v51, 10  ;;  %vm508_vm6 = vcmp.eq.s32.totalorder %v956_v51, 11 }
  0x37   :  { %v697_v18 = vld [vmem:[#allocation9 + $0x38] sm:$0xff]   ;;  %v698_v19 = vld [vmem:[#allocation9 + $0x30] sm:$0xff]   ;;  %v699_v20 = vld [vmem:[#allocation9 + $0x28] sm:$0xff]  }
  0x38   :  { %611 = vmatpush3.bf16.msra.mxu0 %v681_v2  ;;  %631 = vmatpush3.bf16.msra.mxu1 %v690_v6  ;;  %v700_v21 = vld [vmem:[#allocation9 + $0x20] sm:$0xff]   ;;  %v701_v22 = vld [vmem:[#allocation9 + $0x18] sm:$0xff]   ;;  %v702_v33 = vld [vmem:[#allocation9 + $0x10] sm:$0xff]  }
  0x39   :  { %612 = vmatprep.subr.bf16.mxu0 %v841_v0  ;;  %632 = vmatprep.subr.bf16.mxu1 %v841_v0  ;;  %v542_v23 = vld [vmem:[%s984_s2] ss:$0 sm:$0xff]  ;;  %v703_v34 = vld [vmem:[#allocation9 + $0x8] sm:$0xff]   ;;  %v704_v35 = vld [vmem:[#allocation9] sm:$0xff]   ;;  %s843_s2 = smov 0.1  }
  0x3a   :  { %s441_s27 = smax.f32 %s843_s2, %s989_s7  ;;  %v552_v38 = vld [vmem:[%s986_s4] ss:$0 sm:$0xff]  ;;  %vm965_vm4 = vmand %vm496_vm2, %vm497_vm3  ;;  %s844_s4 = smov [#allocation11]  }
  0x3b   :  { %v442_v36 = vstv %s441_s27  ;;  %v561_v49 = vld [vmem:[%s988_s6] ss:$0 sm:$0xff]  ;;  %s528_s6 = sshll.u32 %s844_s4, 4  ;;  %s529_s6 = int_to_ptr.vmem [resolvable:$true] %s528_s6 }
  0x3c   :  { %613 = vmatpush3.bf16.msra.mxu0 %v682_v3  ;;  %633 = vmatpush3.bf16.msra.mxu1 %v691_v8  ;;  %705 = vrcp.f32 %v442_v36  ;;  %s807_s12 = scalar_lea.vmem %s529_s6, 128  ;;  %p812_p7 = scmp.lt.s32.totalorder %s529_s6, %s529_s6 }
  0x3d   :  { %614 = vmatprep.subr.bf16.mxu0 %v841_v0  ;;  %634 = vmatprep.subr.bf16.mxu1 %v841_v0  ;;  %p808_p6 = scmp.ne.s32.totalorder %s529_s6, %s807_s12  ;;  %p813_p8 = scmp.lt.s32.totalorder %s807_s12, %s807_s12 }
  0x3f   :  { %p814_p9 = por %p813_p8, %p812_p7 }
  0x40   :  { %615 = vmatpush3.bf16.msra.mxu0 %v683_v5  ;;  %635 = vmatpush3.bf16.msra.mxu1 %v692_v10 }
  0x41   :  { %616 = vmatprep.subr.bf16.mxu0 %v841_v0  ;;  %636 = vmatprep.subr.bf16.mxu1 %v841_v0  ;;  %p815_p10 = pnand %p814_p9, %p808_p6 }
  0x44   :  { %617 = vmatpush3.bf16.msra.mxu0 %v684_v7  ;;  %637 = vmatpush3.bf16.msra.mxu1 %v693_v12 }
  0x45   :  { %618 = vmatprep.subr.bf16.mxu0 %v841_v0  ;;  %638 = vmatprep.subr.bf16.mxu1 %v841_v0 }
  0x48   :  { %619 = vmatpush3.bf16.msra.mxu0 %v685_v9  ;;  %639 = vmatpush3.bf16.msra.mxu1 %v694_v15 }
  0x49   :  { %620 = vmatprep.subr.bf16.mxu0 %v841_v0  ;;  %640 = vmatprep.subr.bf16.mxu1 %v841_v0  ;;  %v706_v37 = vpop.eup %705 }
  0x4a   :  { %668 = vpush %v706_v37 }
  0x4c   :  { %621 = vmatpush3.bf16.msra.mxu0 %v686_v11  ;;  %641 = vmatpush3.bf16.msra.mxu1 %v695_v16 }
  0x4d   :  { %622 = vmatprep.subr.bf16.mxu0 %v841_v0  ;;  %642 = vmatprep.subr.bf16.mxu1 %v841_v0 }
  0x50   :  { %623 = vmatpush3.bf16.msra.mxu0 %v687_v13  ;;  %643 = vmatpush3.bf16.msra.mxu1 %v696_v17 }
  0x51   :  { %648 = vmatprep.subr.bf16.mxu0 %v841_v0 }
  0x53   :  { %625 = vmatmul.mubr.bf16.vlgmr.msra.gmra.mxu0 %v688_v14 }
  0x54   :  { %664 = vmatprep.mubr.msk.bf16.mxu0 %vm842_vm0, %v841_v0  ;;  %649 = vmatpush3.bf16.msra.mxu0 %v697_v18 }
  0x55   :  { %650 = vmatprep.subr.bf16.mxu0 %v841_v0 }
  0x58   :  { %651 = vmatpush3.bf16.msra.mxu0 %v698_v19 }
  0x59   :  { %652 = vmatprep.subr.bf16.mxu0 %v841_v0 }
  0x5c   :  { %653 = vmatpush3.bf16.msra.mxu0 %v699_v20 }
  0x5d   :  { %654 = vmatprep.subr.bf16.mxu0 %v841_v0 }
  0x60   :  { %655 = vmatpush3.bf16.msra.mxu0 %v700_v21 }
  0x61   :  { %656 = vmatprep.subr.bf16.mxu0 %v841_v0 }
  0x64   :  { %657 = vmatpush3.bf16.msra.mxu0 %v701_v22 }
  0x65   :  { %658 = vmatprep.subr.bf16.mxu0 %v841_v0 }
  0x68   :  { %659 = vmatpush3.bf16.msra.mxu0 %v702_v33 }
  0x69   :  { %660 = vmatprep.subr.bf16.mxu0 %v841_v0 }
  0x6c   :  { %661 = vmatpush3.bf16.msra.mxu0 %v703_v34 }
  0x6d   :  { %662 = vmatprep.subr.bf16.mxu0 %v841_v0 }
  0x70   :  { %663 = vmatpush3.bf16.msra.mxu0 %v704_v35 }
  0x7b   :  { %s669_s7 = spop %668 }
  0x7c   :  { %v445_v52 = vstv %s669_s7 }
 0x113   :  { %v200_v24 = vpop.f32.mrf.mxu0 }
 0x114   :  { %v201_v26 = vadd.f32 %v542_v23, %v200_v24 }
 0x115   :  { %v626_v25 = vpop.f32.mrf.mxu0 }
 0x116   :  { %v207_v30 = vmax.f32 %v201_v26, 0.0 }
 0x117   :  { %v203_v27 = vpop.f32.mrf.mxu0 }
 0x118   :  { %v204_v28 = vadd.f32 %v542_v23, %v203_v27 }
 0x119   :  { %v627_v29 = vpop.f32.mrf.mxu0 }
 0x11a   :  { %v208_v31 = vmax.f32 %v204_v28, 0.0 }
 0x11c   :  { %v209_v32 = vpack.c.bf16 %v208_v31, %v207_v30 }
 0x11e   :  { %645 = vmatmul.mubr.bf16.vlgmr.msra.gmra.mxu1 %v209_v32 }
 0x1de   :  { %v315_v39 = vpop.f32.mrf.mxu1 }
 0x1df   :  { %v316_v41 = vadd.f32 %v552_v38, %v315_v39 }
 0x1e0   :  { %v646_v40 = vpop.f32.mrf.mxu1 }
 0x1e1   :  { %v322_v45 = vmax.f32 %v316_v41, 0.0 }
 0x1e2   :  { %v318_v42 = vpop.f32.mrf.mxu1 }
 0x1e3   :  { %v319_v43 = vadd.f32 %v552_v38, %v318_v42 }
 0x1e4   :  { %v647_v44 = vpop.f32.mrf.mxu1 }
 0x1e5   :  { %v323_v46 = vmax.f32 %v319_v43, 0.0 }
 0x1e7   :  { %v324_v47 = vpack.c.bf16 %v323_v46, %v322_v45 }
 0x1e9   :  { %665 = vmatmul.mubr.bf16.vlgmr.msra.gmra.mxu0 %v324_v47 }
 0x2a9   :  { %v430_v50 = vpop.f32.mrf.mxu0 }
 0x2aa   :  { %v431_v53 = vadd.f32 %v561_v49, %v430_v50 }
 0x2ab   :  { %v666_v54 = vpop.f32.mrf.mxu0 }
 0x2ac   :  { %v446_v55 = vmul.f32 %v445_v52, %v431_v53  ;;  %v570_v10 = vmul.f32 -1.442695, %v431_v53  ;;  %v499_v25 = vsel %vm965_vm4, %v431_v53, 0.0 }
 0x2ad   :  { %v433_v56 = vpop.f32.mrf.mxu0 }
 0x2ae   :  { %v959_v57 = vadd.f32 %v561_v49, %v433_v56  ;;  %v448_v58 = vsel %vm439_vm1, %v446_v55, -inf }
 0x2af   :  { %450 = vmax.xlane.f32.xlu0 %v448_v58  ;;  %v667_v59 = vpop.f32.mrf.mxu0 }
 0x2b0   :  { %v447_v60 = vmul.f32 %v445_v52, %v959_v57  ;;  %v571_v11 = vmul.f32 -1.442695, %v959_v57  ;;  %v500_v35 = vsel %vm965_vm4, %v959_v57, 0.0 }
 0x2b2   :  { %v449_v61 = vsel %vm439_vm1, %v447_v60, -inf }
 0x2b3   :  { %452 = vmax.xlane.f32.xlu0 %v449_v61 }
 0x338   :  { %v451_v62 = vpop.xlane.xlu0 %450 }
 0x339   :  { %v454_v63 = vsub.f32 %v448_v58, %v451_v62  ;;  %v472_v4 = vsub.f32 %v446_v55, %v451_v62 }
 0x33b   :  { %v456_v0 = vmul.f32 1.442695, %v454_v63 }
 0x33c   :  { %v453_v1 = vpop.xlane.xlu0 %452 }
 0x33d   :  { %707 = vpow2.f32 %v456_v0  ;;  %v455_v2 = vsub.f32 %v449_v61, %v453_v1  ;;  %v473_v8 = vsub.f32 %v447_v60, %v453_v1 }
 0x33f   :  { %v458_v3 = vmul.f32 1.442695, %v455_v2 }
 0x341   :  { %709 = vpow2.f32 %v458_v3 }
 0x342   :  { %711 = vpow2.f32 %v570_v10 }
 0x343   :  { %713 = vpow2.f32 %v571_v11 }
 0x34a   :  { %v708_v5 = vpop.eup %707 }
 0x34b   :  { %460 = vadd.xlane.f32.xlu1 %v708_v5  ;;  %v474_v6 = vmul.f32 %v708_v5, %v472_v4 }
 0x34d   :  { %476 = vadd.xlane.f32.xlu0 %v474_v6 }
 0x34e   :  { %v710_v7 = vpop.eup %709 }
 0x34f   :  { %462 = vadd.xlane.f32.xlu1 %v710_v7  ;;  %v475_v9 = vmul.f32 %v710_v7, %v473_v8  ;;  %v712_v12 = vpop.eup %711 }
 0x350   :  { %v714_v13 = vpop.eup %713  ;;  %v490_v14 = vadd.f32 1.0, %v712_v12 }
 0x351   :  { %v491_v15 = vadd.f32 1.0, %v714_v13 }
 0x353   :  { %478 = vadd.xlane.f32.xlu1 %v475_v9 }
 0x3d4   :  { %v461_v16 = vpop.xlane.xlu1 %460 }
 0x3d5   :  { %715 = vrcp.f32 %v461_v16 }
 0x3d6   :  { %717 = vlog2.f32 %v461_v16  ;;  %v477_v20 = vpop.xlane.xlu0 %476 }
 0x3d7   :  { %719 = vrcp.f32 %v490_v14 }
 0x3d8   :  { %721 = vrcp.f32 %v491_v15  ;;  %v463_v17 = vpop.xlane.xlu1 %462 }
 0x3d9   :  { %723 = vrcp.f32 %v463_v17 }
 0x3da   :  { %725 = vlog2.f32 %v463_v17 }
 0x3dc   :  { %v479_v31 = vpop.xlane.xlu1 %478 }
 0x3e2   :  { %v716_v19 = vpop.eup %715 }
 0x3e3   :  { %v718_v21 = vpop.eup %717  ;;  %v466_v22 = vmul.f32 %v716_v19, %v708_v5  ;;  %v480_v23 = vmul.f32 %v716_v19, %v477_v20 }
 0x3e4   :  { %v720_v24 = vpop.eup %719  ;;  %v469_v26 = vmul.f32 0.6931472, %v718_v21 }
 0x3e5   :  { %v722_v27 = vpop.eup %721  ;;  %v501_v28 = vadd.f32 %v499_v25, %v466_v22  ;;  %v504_v36 = vsel %vm503_vm5, %v720_v24, 0.0 }
 0x3e6   :  { %v724_v29 = vpop.eup %723  ;;  %v482_v30 = vsub.f32 %v469_v26, %v480_v23  ;;  %v505_v41 = vsel %vm503_vm5, %v722_v27, 0.0 }
 0x3e7   :  { %v726_v32 = vpop.eup %725  ;;  %v467_v33 = vmul.f32 %v724_v29, %v710_v7  ;;  %v481_v34 = vmul.f32 %v724_v29, %v479_v31  ;;  %v506_v38 = vadd.f32 %v504_v36, %v501_v28 }
 0x3e8   :  { %v471_v37 = vmul.f32 0.6931472, %v726_v32  ;;  %v509_v40 = vsel %vm508_vm6, %v482_v30, 0.0 }
 0x3e9   :  { %v502_v39 = vadd.f32 %v500_v35, %v467_v33  ;;  %v511_v45 = vadd.f32 %v509_v40, %v506_v38 }
 0x3ea   :  { %v483_v42 = vsub.f32 %v471_v37, %v481_v34 }
 0x3eb   :  { %v507_v43 = vadd.f32 %v505_v41, %v502_v39 }
 0x3ec   :  { %v510_v44 = vsel %vm508_vm6, %v483_v42, 0.0 }
 0x3ed   :  { %v512_v46 = vadd.f32 %v510_v44, %v507_v43 }
 0x3ef   :  { %v579_v47 = vpack.c.bf16 %v512_v46, %v511_v45 }
 0x3f1   :  { %580 = vst [vmem:[#allocation11] sm:$0xff] %v579_v47  }
 0x3f2   :  { %818 = shalt.err (!%p815_p10)
}
 0x3f3   :  { %534 = dma.vmem_to_hbm [thread:$0]  %s529_s6, 128, %s990_s8, [#allocation5], %s837_s10, %s837_s10, %s838_s11  }
 0x3f4   :  { %833 = dma.done.wait [#allocation5], 128  }
 0x3f5   :  { %834 = vsyncadd [#allocation5], 4294967168 }
 0x3f6   :  { %538 = vsyncpa [#allocation4], 1 }
 0x3f7   :  { %539 = vsyncpa [#allocation7], 1 }
 0x3f8   :  { %540 = vsyncpa [#allocation10], 1 }
 0x3f9   :  { %541 = vsyncpa [#allocation5], 1 }

</bundles_post_ra>
